<compile_context>
chip_gen: v7x
topology: tpu7x:2x2x1
jax: 0.10.0
libtpu: 0.0.40
codegen_flags: <defaults>
</compile_context>

<pallas_src>
import functools

import jax
import jax.numpy as jnp
from jax.experimental import pallas as pl
from jax.experimental.pallas import tpu as pltpu

LANE = 128  # lane-dense feature width


# ---------------------------------- kernel ----------------------------------

def _gin_fused_kernel(num_layers,
                      adj_ref, h_ref,
                      w1_ref, c1_ref, w2_ref, c2_ref, s3_ref, t3_ref,
                      out_ref):
    """Fused multi-layer GIN forward with JK='sum'.

    adj_ref : (N, N)      dense adjacency
    h_ref   : (N, Dp)     input features, feature axis zero-padded to Dp (lane-dense)
    w1_ref  : (L, Dp, Dp) BN-folded first linear weights
    c1_ref  : (L, 1, Dp)  BN-folded first biases
    w2_ref  : (L, Dp, Dp) BN-folded second linear weights
    c2_ref  : (L, 1, Dp)  BN-folded second biases
    s3_ref  : (L, 1, Dp)  GIN outer-BN scale
    t3_ref  : (L, 1, Dp)  GIN outer-BN shift
    out_ref : (N, Dp)     JK='sum' of per-layer outputs
    """
    adj = adj_ref[...]
    h = h_ref[...]
    jk = jnp.zeros(out_ref.shape, jnp.float32)
    # L is tiny and static -> unroll in Python so everything stays resident.
    for layer in range(num_layers):
        # GINConv, eps = 0 -> z = h + A @ h  (sum neighbor pooling)
        z = h + jnp.dot(adj, h, preferred_element_type=jnp.float32)
        # MLP hidden layer: Linear + BN folded, then ReLU
        u = jnp.maximum(
            jnp.dot(z, w1_ref[layer], preferred_element_type=jnp.float32)
            + c1_ref[layer], 0.0)
        # MLP linear output + ApplyNodeFunc BN folded, then ReLU
        w = jnp.maximum(
            jnp.dot(u, w2_ref[layer], preferred_element_type=jnp.float32)
            + c2_ref[layer], 0.0)
        # GIN outer BN + ReLU (Dropout is identity in eval mode)
        h = jnp.maximum(w * s3_ref[layer] + t3_ref[layer], 0.0)
        jk = jk + h
    out_ref[...] = jk


# --------------------------------- wrapper ----------------------------------

def _pad2d(x, rows, cols):
    return jnp.pad(x, ((0, rows - x.shape[0]), (0, cols - x.shape[1])))


def _fold_and_pack_params(params, dp):
    """Fold eval-mode BN into the linear layers and pad/stack to (L, ...) arrays."""
    w1s, c1s, w2s, c2s, s3s, t3s = [], [], [], [], [], []
    for (w1, b1, s1, t1, w2, b2, s2, t2, s3, t3) in params:
        w1f = w1 * s1            # (din, H) * (1, H)
        c1f = b1 * s1 + t1       # (1, H)
        w2f = w2 * s2
        c2f = b2 * s2 + t2
        w1s.append(_pad2d(w1f, dp, dp))
        c1s.append(_pad2d(c1f, 1, dp))
        w2s.append(_pad2d(w2f, dp, dp))
        c2s.append(_pad2d(c2f, 1, dp))
        s3s.append(_pad2d(s3, 1, dp))
        t3s.append(_pad2d(t3, 1, dp))
    stack = lambda xs: jnp.stack(xs, axis=0)
    return (stack(w1s), stack(c1s), stack(w2s), stack(c2s),
            stack(s3s), stack(t3s))


def gin_forward_pallas(adj, h0, params, hidden_dim):
    """Full GIN forward (all conv layers + JK='sum') in one fused pallas_call."""
    N = adj.shape[0]
    num_layers = len(params)
    # lane-dense padded feature width (covers both input_dim and hidden_dim)
    dp = max(
        ((h0.shape[1] + LANE - 1) // LANE) * LANE,
        ((hidden_dim + LANE - 1) // LANE) * LANE,
        LANE,
    )

    h0p = _pad2d(h0, N, dp)
    w1p, c1p, w2p, c2p, s3p, t3p = _fold_and_pack_params(params, dp)
    inputs = (adj.astype(jnp.float32), h0p, w1p, c1p, w2p, c2p, s3p, t3p)

    vmem_specs = [pl.BlockSpec(memory_space=pltpu.MemorySpace.VMEM)
                  for _ in inputs]

    out = pl.pallas_call(
        functools.partial(_gin_fused_kernel, num_layers),
        out_shape=jax.ShapeDtypeStruct((N, dp), jnp.float32),
        in_specs=vmem_specs,
        out_specs=pl.BlockSpec(memory_space=pltpu.MemorySpace.VMEM),
    )(*inputs)
    return out[:, :hidden_dim]


# --------------------------- pure-JAX reference ------------------------------

def _gin_layer_ref(adj, h, w1, b1, s1, t1, w2, b2, s2, t2, s3, t3):
    z = h + adj @ h
    u = jnp.maximum((z @ w1 + b1) * s1 + t1, 0.0)
    v = u @ w2 + b2
    w = jnp.maximum(v * s2 + t2, 0.0)
    return jnp.maximum(w * s3 + t3, 0.0)


def gin_forward_ref(adj, h, params):
    jk = None
    for p in params:
        h = _gin_layer_ref(adj, h, *p)
        jk = h if jk is None else jk + h
    return jk


# ---------------- parameter construction (deterministic, synthetic) ----------

def _linear_init(key, in_dim, out_dim):
    """PyTorch nn.Linear default init, weight stored transposed as (in, out)."""
    kw, kb = jax.random.split(key)
    bound = 1.0 / jnp.sqrt(in_dim)
    w = jax.random.uniform(kw, (in_dim, out_dim), jnp.float32, -bound, bound)
    b = jax.random.uniform(kb, (1, out_dim), jnp.float32, -bound, bound)
    return w, b


def _bn_init(key, dim, eps=1e-5):
    """Synthetic eval-mode BatchNorm1d params folded into scale/shift (1, dim)."""
    kg, kb, km, kv = jax.random.split(key, 4)
    gamma = jax.random.uniform(kg, (dim,), jnp.float32, 0.8, 1.2)
    beta = 0.1 * jax.random.normal(kb, (dim,), jnp.float32)
    mean = 0.1 * jax.random.normal(km, (dim,), jnp.float32)
    var = jax.random.uniform(kv, (dim,), jnp.float32, 0.5, 1.5)
    s = gamma / jnp.sqrt(var + eps)
    t = beta - mean * s
    return s.reshape(1, dim), t.reshape(1, dim)


def make_gin_params(key, input_dim, hidden_dim, num_layers):
    """num_layers - 1 GIN conv layers, each with a 2-layer MLP (num_mlp_layers=2)."""
    params = []
    for layer in range(num_layers - 1):
        din = input_dim if layer == 0 else hidden_dim
        key, k1, k2, k3, k4, k5 = jax.random.split(key, 6)
        w1, b1 = _linear_init(k1, din, hidden_dim)          # mlp.linears[0]
        s1, t1 = _bn_init(k2, hidden_dim)                   # mlp.batch_norms[0]
        w2, b2 = _linear_init(k3, hidden_dim, hidden_dim)   # mlp.linears[1]
        s2, t2 = _bn_init(k4, hidden_dim)                   # ApplyNodeFunc.bn
        s3, t3 = _bn_init(k5, hidden_dim)                   # GIN.batch_norms[layer]
        params.append((w1, b1, s1, t1, w2, b2, s2, t2, s3, t3))
    return params


if __name__ == "__main__":
    key = jax.random.PRNGKey(0)
    N = 64            # number of graph nodes
    input_dim = 16
    hidden_dim = 32
    num_layers = 3    # -> 2 GIN conv layers

    k_adj, k_feat, k_param = jax.random.split(key, 3)

    # Deterministic random graph: sparse symmetric adjacency, no self loops
    # (self contribution enters via the (1+eps)*h term with eps=0).
    a = (jax.random.uniform(k_adj, (N, N)) < 0.1).astype(jnp.float32)
    adj = jnp.maximum(a, a.T) * (1.0 - jnp.eye(N, dtype=jnp.float32))

    # Node features g.ndata['h'] (already .float())
    h0 = jax.random.normal(k_feat, (N, input_dim), jnp.float32)

    params = make_gin_params(k_param, input_dim, hidden_dim, num_layers)

    out = gin_forward_pallas(adj, h0, params, hidden_dim)
    out = jax.block_until_ready(out)

    ref = gin_forward_ref(adj, h0, params)
    assert out.shape == (N, hidden_dim)
    assert jnp.allclose(out, ref, rtol=1e-2, atol=1e-2), "mismatch vs JAX reference"

    print("KERNEL_OK")
</pallas_src>

<mosaic_0001>
module attributes {stable_mosaic.version = 11 : i64} {
  func.func @_gin_fused_kernel(%arg0: memref<64x64xf32, #tpu.memory_space<vmem>>, %arg1: memref<64x128xf32, #tpu.memory_space<vmem>>, %arg2: memref<2x128x128xf32, #tpu.memory_space<vmem>>, %arg3: memref<2x1x128xf32, #tpu.memory_space<vmem>>, %arg4: memref<2x128x128xf32, #tpu.memory_space<vmem>>, %arg5: memref<2x1x128xf32, #tpu.memory_space<vmem>>, %arg6: memref<2x1x128xf32, #tpu.memory_space<vmem>>, %arg7: memref<2x1x128xf32, #tpu.memory_space<vmem>>, %arg8: memref<64x128xf32, #tpu.memory_space<vmem>>) attributes {dimension_semantics = [], scalar_prefetch = 0 : i64, scratch_operands = 0 : i64, tpu.core_type = #tpu.core_type<tc>} {
    %c0 = arith.constant 0 : index
    %c0_0 = arith.constant 0 : index
    %0 = vector.load %arg0[%c0, %c0_0] : memref<64x64xf32, #tpu.memory_space<vmem>>, vector<64x64xf32>
    %c0_1 = arith.constant 0 : index
    %c0_2 = arith.constant 0 : index
    %1 = vector.load %arg1[%c0_1, %c0_2] : memref<64x128xf32, #tpu.memory_space<vmem>>, vector<64x128xf32>
    %cst = arith.constant 0.000000e+00 : f32
    %2 = vector.broadcast %cst : f32 to vector<64x128xf32>
    %cst_3 = arith.constant dense<0.000000e+00> : vector<64x128xf32>
    %3 = tpu.matmul %0, %1, %cst_3 {dimension_numbers = #tpu.dot_dimension_numbers<[1], [0], [0], [1], [0, 0, 1, 1], [], []>} : vector<64x64xf32>, vector<64x128xf32>, vector<64x128xf32> -> vector<64x128xf32>
    %4 = arith.addf %1, %3 : vector<64x128xf32>
    %c0_4 = arith.constant 0 : index
    %c0_5 = arith.constant 0 : index
    %c0_6 = arith.constant 0 : index
    %5 = vector.load %arg2[%c0_4, %c0_5, %c0_6] : memref<2x128x128xf32, #tpu.memory_space<vmem>>, vector<1x128x128xf32>
    %6 = vector.shape_cast %5 : vector<1x128x128xf32> to vector<128x128xf32>
    %cst_7 = arith.constant dense<0.000000e+00> : vector<64x128xf32>
    %7 = tpu.matmul %4, %6, %cst_7 {dimension_numbers = #tpu.dot_dimension_numbers<[1], [0], [0], [1], [0, 0, 1, 1], [], []>} : vector<64x128xf32>, vector<128x128xf32>, vector<64x128xf32> -> vector<64x128xf32>
    %c0_8 = arith.constant 0 : index
    %c0_9 = arith.constant 0 : index
    %c0_10 = arith.constant 0 : index
    %8 = vector.load %arg3[%c0_8, %c0_9, %c0_10] : memref<2x1x128xf32, #tpu.memory_space<vmem>>, vector<1x1x128xf32>
    %9 = vector.shape_cast %8 : vector<1x1x128xf32> to vector<1x128xf32>
    %10 = vector.broadcast %9 : vector<1x128xf32> to vector<64x128xf32>
    %11 = arith.addf %7, %10 : vector<64x128xf32>
    %cst_11 = arith.constant 0.000000e+00 : f32
    %12 = vector.broadcast %cst_11 : f32 to vector<64x128xf32>
    %13 = arith.maximumf %11, %12 : vector<64x128xf32>
    %c0_12 = arith.constant 0 : index
    %c0_13 = arith.constant 0 : index
    %c0_14 = arith.constant 0 : index
    %14 = vector.load %arg4[%c0_12, %c0_13, %c0_14] : memref<2x128x128xf32, #tpu.memory_space<vmem>>, vector<1x128x128xf32>
    %15 = vector.shape_cast %14 : vector<1x128x128xf32> to vector<128x128xf32>
    %cst_15 = arith.constant dense<0.000000e+00> : vector<64x128xf32>
    %16 = tpu.matmul %13, %15, %cst_15 {dimension_numbers = #tpu.dot_dimension_numbers<[1], [0], [0], [1], [0, 0, 1, 1], [], []>} : vector<64x128xf32>, vector<128x128xf32>, vector<64x128xf32> -> vector<64x128xf32>
    %c0_16 = arith.constant 0 : index
    %c0_17 = arith.constant 0 : index
    %c0_18 = arith.constant 0 : index
    %17 = vector.load %arg5[%c0_16, %c0_17, %c0_18] : memref<2x1x128xf32, #tpu.memory_space<vmem>>, vector<1x1x128xf32>
    %18 = vector.shape_cast %17 : vector<1x1x128xf32> to vector<1x128xf32>
    %19 = vector.broadcast %18 : vector<1x128xf32> to vector<64x128xf32>
    %20 = arith.addf %16, %19 : vector<64x128xf32>
    %cst_19 = arith.constant 0.000000e+00 : f32
    %21 = vector.broadcast %cst_19 : f32 to vector<64x128xf32>
    %22 = arith.maximumf %20, %21 : vector<64x128xf32>
    %c0_20 = arith.constant 0 : index
    %c0_21 = arith.constant 0 : index
    %c0_22 = arith.constant 0 : index
    %23 = vector.load %arg6[%c0_20, %c0_21, %c0_22] : memref<2x1x128xf32, #tpu.memory_space<vmem>>, vector<1x1x128xf32>
    %24 = vector.shape_cast %23 : vector<1x1x128xf32> to vector<1x128xf32>
    %25 = vector.broadcast %24 : vector<1x128xf32> to vector<64x128xf32>
    %26 = arith.mulf %22, %25 : vector<64x128xf32>
    %c0_23 = arith.constant 0 : index
    %c0_24 = arith.constant 0 : index
    %c0_25 = arith.constant 0 : index
    %27 = vector.load %arg7[%c0_23, %c0_24, %c0_25] : memref<2x1x128xf32, #tpu.memory_space<vmem>>, vector<1x1x128xf32>
    %28 = vector.shape_cast %27 : vector<1x1x128xf32> to vector<1x128xf32>
    %29 = vector.broadcast %28 : vector<1x128xf32> to vector<64x128xf32>
    %30 = arith.addf %26, %29 : vector<64x128xf32>
    %cst_26 = arith.constant 0.000000e+00 : f32
    %31 = vector.broadcast %cst_26 : f32 to vector<64x128xf32>
    %32 = arith.maximumf %30, %31 : vector<64x128xf32>
    %33 = arith.addf %2, %32 : vector<64x128xf32>
    %cst_27 = arith.constant dense<0.000000e+00> : vector<64x128xf32>
    %34 = tpu.matmul %0, %32, %cst_27 {dimension_numbers = #tpu.dot_dimension_numbers<[1], [0], [0], [1], [0, 0, 1, 1], [], []>} : vector<64x64xf32>, vector<64x128xf32>, vector<64x128xf32> -> vector<64x128xf32>
    %35 = arith.addf %32, %34 : vector<64x128xf32>
    %c1 = arith.constant 1 : index
    %c0_28 = arith.constant 0 : index
    %c0_29 = arith.constant 0 : index
    %36 = vector.load %arg2[%c1, %c0_28, %c0_29] : memref<2x128x128xf32, #tpu.memory_space<vmem>>, vector<1x128x128xf32>
    %37 = vector.shape_cast %36 : vector<1x128x128xf32> to vector<128x128xf32>
    %cst_30 = arith.constant dense<0.000000e+00> : vector<64x128xf32>
    %38 = tpu.matmul %35, %37, %cst_30 {dimension_numbers = #tpu.dot_dimension_numbers<[1], [0], [0], [1], [0, 0, 1, 1], [], []>} : vector<64x128xf32>, vector<128x128xf32>, vector<64x128xf32> -> vector<64x128xf32>
    %c1_31 = arith.constant 1 : index
    %c0_32 = arith.constant 0 : index
    %c0_33 = arith.constant 0 : index
    %39 = vector.load %arg3[%c1_31, %c0_32, %c0_33] : memref<2x1x128xf32, #tpu.memory_space<vmem>>, vector<1x1x128xf32>
    %40 = vector.shape_cast %39 : vector<1x1x128xf32> to vector<1x128xf32>
    %41 = vector.broadcast %40 : vector<1x128xf32> to vector<64x128xf32>
    %42 = arith.addf %38, %41 : vector<64x128xf32>
    %cst_34 = arith.constant 0.000000e+00 : f32
    %43 = vector.broadcast %cst_34 : f32 to vector<64x128xf32>
    %44 = arith.maximumf %42, %43 : vector<64x128xf32>
    %c1_35 = arith.constant 1 : index
    %c0_36 = arith.constant 0 : index
    %c0_37 = arith.constant 0 : index
    %45 = vector.load %arg4[%c1_35, %c0_36, %c0_37] : memref<2x128x128xf32, #tpu.memory_space<vmem>>, vector<1x128x128xf32>
    %46 = vector.shape_cast %45 : vector<1x128x128xf32> to vector<128x128xf32>
    %cst_38 = arith.constant dense<0.000000e+00> : vector<64x128xf32>
    %47 = tpu.matmul %44, %46, %cst_38 {dimension_numbers = #tpu.dot_dimension_numbers<[1], [0], [0], [1], [0, 0, 1, 1], [], []>} : vector<64x128xf32>, vector<128x128xf32>, vector<64x128xf32> -> vector<64x128xf32>
    %c1_39 = arith.constant 1 : index
    %c0_40 = arith.constant 0 : index
    %c0_41 = arith.constant 0 : index
    %48 = vector.load %arg5[%c1_39, %c0_40, %c0_41] : memref<2x1x128xf32, #tpu.memory_space<vmem>>, vector<1x1x128xf32>
    %49 = vector.shape_cast %48 : vector<1x1x128xf32> to vector<1x128xf32>
    %50 = vector.broadcast %49 : vector<1x128xf32> to vector<64x128xf32>
    %51 = arith.addf %47, %50 : vector<64x128xf32>
    %cst_42 = arith.constant 0.000000e+00 : f32
    %52 = vector.broadcast %cst_42 : f32 to vector<64x128xf32>
    %53 = arith.maximumf %51, %52 : vector<64x128xf32>
    %c1_43 = arith.constant 1 : index
    %c0_44 = arith.constant 0 : index
    %c0_45 = arith.constant 0 : index
    %54 = vector.load %arg6[%c1_43, %c0_44, %c0_45] : memref<2x1x128xf32, #tpu.memory_space<vmem>>, vector<1x1x128xf32>
    %55 = vector.shape_cast %54 : vector<1x1x128xf32> to vector<1x128xf32>
    %56 = vector.broadcast %55 : vector<1x128xf32> to vector<64x128xf32>
    %57 = arith.mulf %53, %56 : vector<64x128xf32>
    %c1_46 = arith.constant 1 : index
    %c0_47 = arith.constant 0 : index
    %c0_48 = arith.constant 0 : index
    %58 = vector.load %arg7[%c1_46, %c0_47, %c0_48] : memref<2x1x128xf32, #tpu.memory_space<vmem>>, vector<1x1x128xf32>
    %59 = vector.shape_cast %58 : vector<1x1x128xf32> to vector<1x128xf32>
    %60 = vector.broadcast %59 : vector<1x128xf32> to vector<64x128xf32>
    %61 = arith.addf %57, %60 : vector<64x128xf32>
    %cst_49 = arith.constant 0.000000e+00 : f32
    %62 = vector.broadcast %cst_49 : f32 to vector<64x128xf32>
    %63 = arith.maximumf %61, %62 : vector<64x128xf32>
    %64 = arith.addf %33, %63 : vector<64x128xf32>
    %c0_50 = arith.constant 0 : index
    %c0_51 = arith.constant 0 : index
    %65 = vector.load %arg8[%c0_50, %c0_51] : memref<64x128xf32, #tpu.memory_space<vmem>>, vector<64x128xf32>
    tpu.vector_store %arg8[%c0_50, %c0_51], %64 {strides = array<i32>} : memref<64x128xf32, #tpu.memory_space<vmem>>, vector<64x128xf32>,
    return
  }
}

</mosaic_0001>

<bundles_post_ra>
// kernel: tpu_custom_call.1
= control target key start
LH: loop header
LB: loop body
LE: loop exit
PB: predicated region body
PF: predicated region fallthrough
CT: control target
= control target key end

     0   :  { %13 = vsyncpa [#allocation3], 0  ;;  %s1979_s0 = inlined_call_operand.hbm [shape: f32[64,64], index: 0, kind: input, shape index: {}]   ;;  %s1980_s1 = inlined_call_operand.hbm [shape: f32[64,128], index: 1, kind: input, shape index: {}]   ;;  %s1981_s2 = inlined_call_operand.hbm [shape: f32[2,128,128], index: 2, kind: input, shape index: {}]   ;;  %s1982_s3 = inlined_call_operand.vmem [shape: f32[2,1,128], index: 3, kind: input, shape index: {}]   ;;  %s1983_s4 = inlined_call_operand.hbm [shape: f32[2,128,128], index: 4, kind: input, shape index: {}]   ;;  %s1984_s5 = inlined_call_operand.vmem [shape: f32[2,1,128], index: 5, kind: input, shape index: {}]   ;;  %s1985_s6 = inlined_call_operand.vmem [shape: f32[2,1,128], index: 6, kind: input, shape index: {}]   ;;  %s1986_s7 = inlined_call_operand.vmem [shape: f32[2,1,128], index: 7, kind: input, shape index: {}]   ;;  %s1987_s8 = inlined_call_operand.hbm [shape: f32[64,128], index: 8, kind: output, shape index: {}]  }
   0x1   :  { %14 = vsyncpa [#allocation6], 0 }
   0x2   :  { %15 = vsyncpa [#allocation9], 0 }
   0x3   :  { %16 = vsyncpa [#allocation4], 0  ;;  %s1694_s27 = smov [#allocation5]   ;;  %s1695_s29 = smov [#allocation2]  }
   0x4   :  { %s34_s28 = sshll.u32 %s1694_s27, 4  ;;  %s22_s30 = sshll.u32 %s1695_s29, 4  ;;  %s35_s28 = int_to_ptr.vmem [resolvable:$true] %s34_s28  ;;  %s1746_s30 = int_to_ptr.vmem [resolvable:$true] %s22_s30 }
   0x5   :  { %s1576_s11 = scalar_lea.hbm %s1980_s1, 1024 }
   0x6   :  { %p1577_p0 = scmp.ne.s32.totalorder %s1980_s1, %s1576_s11  ;;  %p1580_p1 = scmp.lt.u32.totalorder %s1576_s11, %s1980_s1 }
   0x8   :  { %p1582_p2 = pnand %p1580_p1, %p1577_p0 }
   0xa   :  { %1585 = shalt.err (!%p1582_p2)
}
   0xb   :  { %s1586_s16 = scalar_lea.vmem %s35_s28, 1024  ;;  %p1591_p4 = scmp.lt.s32.totalorder %s35_s28, %s35_s28 }
   0xc   :  { %p1587_p3 = scmp.ne.s32.totalorder %s35_s28, %s1586_s16  ;;  %p1592_p5 = scmp.lt.s32.totalorder %s1586_s16, %s1586_s16 }
   0xe   :  { %p1593_p6 = por %p1592_p5, %p1591_p4 }
  0x10   :  { %p1594_p7 = pnand %p1593_p6, %p1587_p3 }
  0x12   :  { %1597 = shalt.err (!%p1594_p7)
}
  0x13   :  { %s1696_s17 = smov 128   ;;  %s1697_s18 = smov 8  }
  0x14   :  { %40 = dma.hbm_to_vmem [thread:$0]  %s1980_s1, 1024, %s35_s28, [#allocation6], %s1696_s17, %s1696_s17, %s1697_s18  }
  0x15   :  { %s1598_s23 = scalar_lea.hbm %s1979_s0, 1024 }
  0x16   :  { %p1599_p8 = scmp.ne.s32.totalorder %s1979_s0, %s1598_s23  ;;  %p1602_p9 = scmp.lt.u32.totalorder %s1598_s23, %s1979_s0 }
  0x18   :  { %p1604_p10 = pnand %p1602_p9, %p1599_p8 }
  0x1a   :  { %1607 = shalt.err (!%p1604_p10)
}
  0x1b   :  { %s1608_s29 = scalar_lea.vmem %s1746_s30, 1024  ;;  %p1613_p12 = scmp.lt.s32.totalorder %s1746_s30, %s1746_s30 }
  0x1c   :  { %p1609_p11 = scmp.ne.s32.totalorder %s1746_s30, %s1608_s29  ;;  %p1614_p13 = scmp.lt.s32.totalorder %s1608_s29, %s1608_s29 }
  0x1e   :  { %p1615_p0 = por %p1614_p13, %p1613_p12 }
  0x20   :  { %p1616_p1 = pnand %p1615_p0, %p1609_p11 }
  0x22   :  { %1619 = shalt.err (!%p1616_p1)
}
  0x23   :  { %28 = dma.hbm_to_vmem [thread:$0]  %s1979_s0, 1024, %s1746_s30, [#allocation3], %s1696_s17, %s1696_s17, %s1697_s18  }
  0x24   :  { %s1698_s9 = smov [#allocation7]   ;;  %s1699_s11 = smov [#allocation8]  }
  0x25   :  { %s46_s10 = sshll.u32 %s1698_s9, 4  ;;  %s60_s12 = sshll.u32 %s1699_s11, 4  ;;  %s47_s10 = int_to_ptr.vmem [resolvable:$true] %s46_s10  ;;  %s1783_s12 = int_to_ptr.vmem [resolvable:$true] %s60_s12 }
  0x26   :  { %s1620_s15 = scalar_lea.hbm %s1981_s2, 4096 }
  0x27   :  { %p1621_p2 = scmp.ne.s32.totalorder %s1981_s2, %s1620_s15  ;;  %p1624_p3 = scmp.lt.u32.totalorder %s1620_s15, %s1981_s2 }
  0x29   :  { %p1626_p4 = pnand %p1624_p3, %p1621_p2 }
  0x2b   :  { %1629 = shalt.err (!%p1626_p4)
}
  0x2c   :  { %s1630_s0 = scalar_lea.vmem %s47_s10, 4096  ;;  %p1635_p6 = scmp.lt.s32.totalorder %s47_s10, %s47_s10 }
  0x2d   :  { %p1631_p5 = scmp.ne.s32.totalorder %s47_s10, %s1630_s0  ;;  %p1636_p7 = scmp.lt.s32.totalorder %s1630_s0, %s1630_s0 }
  0x2f   :  { %p1637_p8 = por %p1636_p7, %p1635_p6 }
  0x31   :  { %p1638_p9 = pnand %p1637_p8, %p1631_p5 }
  0x33   :  { %1641 = shalt.err (!%p1638_p9)
}
  0x34   :  { %52 = dma.hbm_to_vmem [thread:$0]  %s1981_s2, 4096, %s47_s10, [#allocation6], %s1696_s17, %s1696_s17, %s1697_s18  }
  0x35   :  { %s1642_s25 = scalar_lea.hbm %s1983_s4, 4096 }
  0x36   :  { %p1643_p10 = scmp.ne.s32.totalorder %s1983_s4, %s1642_s25  ;;  %p1646_p11 = scmp.lt.u32.totalorder %s1642_s25, %s1983_s4 }
  0x38   :  { %p1648_p12 = pnand %p1646_p11, %p1643_p10 }
  0x3a   :  { %1651 = shalt.err (!%p1648_p12)
}
  0x3b   :  { %s1652_s28 = scalar_lea.vmem %s1783_s12, 4096  ;;  %p1657_p0 = scmp.lt.s32.totalorder %s1783_s12, %s1783_s12 }
  0x3c   :  { %p1653_p13 = scmp.ne.s32.totalorder %s1783_s12, %s1652_s28  ;;  %p1658_p1 = scmp.lt.s32.totalorder %s1652_s28, %s1652_s28 }
  0x3e   :  { %p1659_p2 = por %p1658_p1, %p1657_p0 }
  0x40   :  { %p1660_p3 = pnand %p1659_p2, %p1653_p13 }
  0x42   :  { %1663 = shalt.err (!%p1660_p3)
}
  0x43   :  { %66 = dma.hbm_to_vmem [thread:$0]  %s1983_s4, 4096, %s1783_s12, [#allocation9], %s1696_s17, %s1696_s17, %s1697_s18  }
  0x44   :  { %1686 = dma.done.wait [#allocation3], 1024  }
  0x45   :  { %1687 = vsyncadd [#allocation3], 4294966272 }
  0x46   :  { %1688 = dma.done.wait [#allocation6], 5120  }
  0x47   :  { %1689 = vsyncadd [#allocation6], 4294962176 }
  0x48   :  { %1690 = dma.done.wait [#allocation9], 4096  }
  0x49   :  { %1691 = vsyncadd [#allocation9], 4294963200  ;;  %v1820_v0 = vld [vmem:[#allocation5] sm:$0xff]  ;;  %v1822_v1 = vld [vmem:[#allocation5 + $0x8] sm:$0xff]  ;;  %vm101_vm0 = vcmask 523264  }
  0x4a   :  { %v1824_v2 = vld [vmem:[#allocation5 + $0x10] sm:$0xff]  ;;  %v1409_v3 = vpack.c.bf16 %v1822_v1, %v1820_v0  ;;  %v1828_v4 = vld [vmem:[#allocation5 + $0x18] sm:$0xff]  ;;  %v1832_v6 = vld [vmem:[#allocation5 + $0x20] sm:$0xff] }
  0x4b   :  { %v1413_v5 = vpack.c.bf16 %v1828_v4, %v1824_v2  ;;  %v1834_v7 = vld [vmem:[#allocation5 + $0x28] sm:$0xff]  ;;  %v1836_v8 = vld [vmem:[#allocation2] sm:$0xff]  ;;  %v1842_v10 = vld [vmem:[#allocation5 + $0x30] sm:$0xff] }
  0x4c   :  { %1410 = vmatprep.subr.bf16.mxu0 %v1409_v3  ;;  %1193 = vmatprep.mubr.msk.f32.mxu0 %vm101_vm0, %v1836_v8  ;;  %v1417_v9 = vpack.c.bf16 %v1834_v7, %v1832_v6  ;;  %v239_v11 = vld [vmem:[#allocation7] sm:$0xff]  ;;  %v240_v12 = vld [vmem:[#allocation7 + $0x8] sm:$0xff]  ;;  %v1844_v13 = vld [vmem:[#allocation5 + $0x38] sm:$0xff] }
  0x4d   :  { %1412 = vmatpush3.bf16.msra.mxu0 %v1409_v3  ;;  %v1425_v14 = vpack.c.bf16 %v240_v12, %v239_v11  ;;  %v241_v15 = vld [vmem:[#allocation7 + $0x10] sm:$0xff]  ;;  %v242_v16 = vld [vmem:[#allocation7 + $0x18] sm:$0xff]  ;;  %v243_v18 = vld [vmem:[#allocation7 + $0x20] sm:$0xff]  ;;  %v1421_v20 = vpack.c.bf16 %v1844_v13, %v1842_v10 }
  0x4e   :  { %1414 = vmatprep.subr.bf16.mxu0 %v1413_v5  ;;  %v1429_v17 = vpack.c.bf16 %v242_v16, %v241_v15  ;;  %v244_v19 = vld [vmem:[#allocation7 + $0x28] sm:$0xff]  ;;  %v245_v22 = vld [vmem:[#allocation7 + $0x30] sm:$0xff]  ;;  %v246_v23 = vld [vmem:[#allocation7 + $0x38] sm:$0xff] }
  0x4f   :  { %1426 = vmatprep.subr.bf16.mxu1 %v1425_v14  ;;  %v1433_v21 = vpack.c.bf16 %v244_v19, %v243_v18  ;;  %v1437_v24 = vpack.c.bf16 %v246_v23, %v245_v22  ;;  %v247_v25 = vld [vmem:[#allocation7 + $0x40] sm:$0xff]  ;;  %v248_v26 = vld [vmem:[#allocation7 + $0x48] sm:$0xff]  ;;  %v1850_v28 = vld [vmem:[#allocation2 + $0x10] sm:$0xff] }
  0x50   :  { %1428 = vmatpush3.bf16.msra.mxu1 %v1425_v14  ;;  %v1848_v27 = vld [vmem:[#allocation2 + $0x8] sm:$0xff]  ;;  %v1441_v29 = vpack.c.bf16 %v248_v26, %v247_v25  ;;  %v249_v30 = vld [vmem:[#allocation7 + $0x50] sm:$0xff]  ;;  %v250_v31 = vld [vmem:[#allocation7 + $0x58] sm:$0xff] }
  0x51   :  { %1416 = vmatpush3.bf16.msra.mxu0 %v1413_v5  ;;  %1430 = vmatprep.subr.bf16.mxu1 %v1429_v17  ;;  %v1856_v32 = vld [vmem:[#allocation2 + $0x18] sm:$0xff]  ;;  %v1858_v33 = vld [vmem:[#allocation2 + $0x20] sm:$0xff]  ;;  %v1445_v34 = vpack.c.bf16 %v250_v31, %v249_v30  ;;  %v252_v36 = vld [vmem:[#allocation7 + $0x68] sm:$0xff] }
  0x52   :  { %1418 = vmatprep.subr.bf16.mxu0 %v1417_v9  ;;  %v251_v35 = vld [vmem:[#allocation7 + $0x60] sm:$0xff]  ;;  %v1864_v37 = vld [vmem:[#allocation2 + $0x28] sm:$0xff]  ;;  %v1866_v38 = vld [vmem:[#allocation2 + $0x30] sm:$0xff] }
  0x53   :  { %v1449_v39 = vpack.c.bf16 %v252_v36, %v251_v35  ;;  %v1872_v40 = vld [vmem:[#allocation2 + $0x38] sm:$0xff]  ;;  %v253_v41 = vld [vmem:[#allocation7 + $0x70] sm:$0xff]  ;;  %v375_v44 = vld [vmem:[#allocation8] sm:$0xff] }
  0x54   :  { %1432 = vmatpush3.bf16.msra.mxu1 %v1429_v17  ;;  %v254_v42 = vld [vmem:[#allocation7 + $0x78] sm:$0xff]  ;;  %v376_v45 = vld [vmem:[#allocation8 + $0x8] sm:$0xff]  ;;  %v377_v46 = vld [vmem:[#allocation8 + $0x10] sm:$0xff] }
  0x55   :  { %1420 = vmatpush3.bf16.msra.mxu0 %v1417_v9  ;;  %1434 = vmatprep.subr.bf16.mxu1 %v1433_v21  ;;  %v1453_v43 = vpack.c.bf16 %v254_v42, %v253_v41  ;;  %v1457_v47 = vpack.c.bf16 %v376_v45, %v375_v44  ;;  %v378_v48 = vld [vmem:[#allocation8 + $0x18] sm:$0xff]  ;;  %v379_v50 = vld [vmem:[#allocation8 + $0x20] sm:$0xff]  ;;  %v380_v51 = vld [vmem:[#allocation8 + $0x28] sm:$0xff] }
  0x56   :  { %1422 = vmatprep.subr.bf16.mxu0 %v1421_v20  ;;  %v1461_v49 = vpack.c.bf16 %v378_v48, %v377_v46  ;;  %v1465_v52 = vpack.c.bf16 %v380_v51, %v379_v50  ;;  %v381_v53 = vld [vmem:[#allocation8 + $0x30] sm:$0xff]  ;;  %v382_v54 = vld [vmem:[#allocation8 + $0x38] sm:$0xff]  ;;  %v383_v56 = vld [vmem:[#allocation8 + $0x40] sm:$0xff] }
  0x57   :  { %v1469_v55 = vpack.c.bf16 %v382_v54, %v381_v53  ;;  %v384_v57 = vld [vmem:[#allocation8 + $0x48] sm:$0xff]  ;;  %v385_v59 = vld [vmem:[#allocation8 + $0x50] sm:$0xff]  ;;  %v386_v60 = vld [vmem:[#allocation8 + $0x58] sm:$0xff] }
  0x58   :  { %1436 = vmatpush3.bf16.msra.mxu1 %v1433_v21  ;;  %v1473_v58 = vpack.c.bf16 %v384_v57, %v383_v56  ;;  %v1477_v61 = vpack.c.bf16 %v386_v60, %v385_v59  ;;  %v387_v62 = vld [vmem:[#allocation8 + $0x60] sm:$0xff]  ;;  %v388_v63 = vld [vmem:[#allocation8 + $0x68] sm:$0xff]  ;;  %v673_v54 = vld [vmem:[#allocation7 + $0x90] sm:$0xff] }
  0x59   :  { %1424 = vmatpush3.bf16.msra.mxu0 %v1421_v20  ;;  %1438 = vmatprep.subr.bf16.mxu1 %v1437_v24  ;;  %v1481_v3 = vpack.c.bf16 %v388_v63, %v387_v62  ;;  %v672_v53 = vld [vmem:[#allocation7 + $0x88] sm:$0xff]  ;;  %v674_v56 = vld [vmem:[#allocation7 + $0x98] sm:$0xff] }
  0x5a   :  { %1458 = vmatprep.subr.bf16.mxu0 %v1457_v47  ;;  %v1509_v57 = vpack.c.bf16 %v674_v56, %v673_v54  ;;  %v676_v59 = vld [vmem:[#allocation7 + $0xa8] sm:$0xff]  ;;  %v678_v62 = vld [vmem:[#allocation7 + $0xb8] sm:$0xff] }
  0x5c   :  { %1194 = vmatmul.mubr.msk.f32.vlgmr.msra.gmra.mrb[0].mxu0 %vm101_vm0, %v1848_v27  ;;  %1440 = vmatpush3.bf16.msra.mxu1 %v1437_v24 }
  0x5d   :  { %1196 = vmatprep.mubr.msk.f32.mxu0 %vm101_vm0, %v1850_v28  ;;  %1442 = vmatprep.subr.bf16.mxu1 %v1441_v29 }
  0x5e   :  { %1460 = vmatpush3.bf16.msra.mxu0 %v1457_v47 }
  0x5f   :  { %1462 = vmatprep.subr.bf16.mxu0 %v1461_v49 }
  0x60   :  { %1197 = vmatmul.mubr.msk.f32.gmra.mrb[2].mxu0 %vm101_vm0, %v1856_v32  ;;  %1444 = vmatpush3.bf16.msra.mxu1 %v1441_v29 }
  0x61   :  { %1199 = vmatprep.mubr.msk.f32.mxu0 %vm101_vm0, %v1858_v33  ;;  %1446 = vmatprep.subr.bf16.mxu1 %v1445_v34 }
  0x62   :  { %1464 = vmatpush3.bf16.msra.mxu0 %v1461_v49 }
  0x63   :  { %1466 = vmatprep.subr.bf16.mxu0 %v1465_v52 }
  0x64   :  { %1200 = vmatmul.mubr.msk.f32.gmra.mrb[4].mxu0 %vm101_vm0, %v1864_v37  ;;  %1448 = vmatpush3.bf16.msra.mxu1 %v1445_v34 }
  0x65   :  { %1202 = vmatprep.mubr.msk.f32.mxu0 %vm101_vm0, %v1866_v38  ;;  %1450 = vmatprep.subr.bf16.mxu1 %v1449_v39 }
  0x66   :  { %1468 = vmatpush3.bf16.msra.mxu0 %v1465_v52  ;;  %v671_v52 = vld [vmem:[#allocation7 + $0x80] sm:$0xff] }
  0x67   :  { %1470 = vmatprep.subr.bf16.mxu0 %v1469_v55 }
  0x68   :  { %1203 = vmatmul.mubr.msk.f32.gmra.mrb[6].mxu0 %vm101_vm0, %v1872_v40  ;;  %1452 = vmatpush3.bf16.msra.mxu1 %v1449_v39 }
  0x69   :  { %1454 = vmatprep.subr.bf16.mxu1 %v1453_v43 }
  0x6a   :  { %1472 = vmatpush3.bf16.msra.mxu0 %v1469_v55  ;;  %v1505_v55 = vpack.c.bf16 %v672_v53, %v671_v52 }
  0x6b   :  { %1474 = vmatprep.subr.bf16.mxu0 %v1473_v58 }
  0x6c   :  { %1456 = vmatpush3.bf16.msra.mxu1 %v1453_v43 }
  0x6e   :  { %1476 = vmatpush3.bf16.msra.mxu0 %v1473_v58  ;;  %v675_v58 = vld [vmem:[#allocation7 + $0xa0] sm:$0xff] }
  0x6f   :  { %1478 = vmatprep.subr.bf16.mxu0 %v1477_v61  ;;  %v1513_v60 = vpack.c.bf16 %v676_v59, %v675_v58 }
  0x72   :  { %1480 = vmatpush3.bf16.msra.mxu0 %v1477_v61  ;;  %v677_v61 = vld [vmem:[#allocation7 + $0xb0] sm:$0xff] }
  0x73   :  { %1482 = vmatprep.subr.bf16.mxu0 %v1481_v3  ;;  %v1517_v63 = vpack.c.bf16 %v678_v62, %v677_v61 }
  0x76   :  { %1484 = vmatpush3.bf16.msra.mxu0 %v1481_v3  ;;  %v679_v3 = vld [vmem:[#allocation7 + $0xc0] sm:$0xff] }
 0x12f   :  { %v1195_v5 = vpop.f32.mrb[0].mxu0 }
 0x130   :  { %v192_v9 = vpop.f32.mrb[1].mxu0  ;;  %v232_v12 = vadd.f32 %v1195_v5, %v1822_v1  ;;  %v680_v5 = vld [vmem:[#allocation7 + $0xc8] sm:$0xff] }
 0x131   :  { %v231_v11 = vadd.f32 %v192_v9, %v1820_v0  ;;  %v1521_v9 = vpack.c.bf16 %v680_v5, %v679_v3 }
 0x133   :  { %v1198_v14 = vpop.f32.mrb[2].mxu0  ;;  %1237 = vmatprep.mubr.f32.mxu1 %v231_v11  ;;  %v681_v11 = vld [vmem:[#allocation7 + $0xd0] sm:$0xff] }
 0x134   :  { %v202_v15 = vpop.f32.mrb[3].mxu0  ;;  %1238 = vmatmul.mubr.f32.vlgmr.msra.gmra.mrb[0].mxu1 %v232_v12  ;;  %v234_v17 = vadd.f32 %v1198_v14, %v1828_v4  ;;  %v390_v4 = vld [vmem:[#allocation8 + $0x78] sm:$0xff] }
 0x135   :  { %v233_v16 = vadd.f32 %v202_v15, %v1824_v2  ;;  %v389_v2 = vld [vmem:[#allocation8 + $0x70] sm:$0xff]  ;;  %v682_v12 = vld [vmem:[#allocation7 + $0xd8] sm:$0xff]  ;;  %v683_v15 = vld [vmem:[#allocation7 + $0xe0] sm:$0xff] }
 0x136   :  { %v1485_v24 = vpack.c.bf16 %v390_v4, %v389_v2  ;;  %v1525_v14 = vpack.c.bf16 %v682_v12, %v681_v11 }
 0x137   :  { %v1201_v18 = vpop.f32.mrb[4].mxu0  ;;  %1240 = vmatprep.mubr.f32.mxu1 %v233_v16  ;;  %v684_v16 = vld [vmem:[#allocation7 + $0xe8] sm:$0xff] }
 0x138   :  { %v212_v19 = vpop.f32.mrb[5].mxu0  ;;  %1241 = vmatmul.mubr.f32.gmra.mrb[2].mxu1 %v234_v17  ;;  %v236_v21 = vadd.f32 %v1201_v18, %v1834_v7  ;;  %1486 = vmatprep.subr.bf16.mxu0 %v1485_v24  ;;  %v1529_v17 = vpack.c.bf16 %v684_v16, %v683_v15  ;;  %v1030_v18 = vld [vmem:[%s1984_s5] ss:$0 sm:$0xff]  ;;  %v685_v16 = vld [vmem:[#allocation7 + $0xf0] sm:$0xff] }
 0x139   :  { %v235_v20 = vadd.f32 %v212_v19, %v1832_v6  ;;  %1488 = vmatpush3.bf16.msra.mxu0 %v1485_v24  ;;  %v1029_v6 = vld [vmem:[%s1982_s3] ss:$0 sm:$0xff] }
 0x13a   :  { %1506 = vmatprep.subr.bf16.mxu0 %v1505_v55 }
 0x13b   :  { %v1204_v22 = vpop.f32.mrb[6].mxu0  ;;  %1243 = vmatprep.mubr.f32.mxu1 %v235_v20 }
 0x13c   :  { %v222_v0 = vpop.f32.mrb[7].mxu0  ;;  %1244 = vmatmul.mubr.f32.gmra.mrb[4].mxu1 %v236_v21  ;;  %v238_v23 = vadd.f32 %v1204_v22, %v1844_v13  ;;  %v1031_v22 = vld [vmem:[%s1985_s6] ss:$0 sm:$0xff] }
 0x13d   :  { %v237_v1 = vadd.f32 %v222_v0, %v1842_v10 }
 0x13f   :  { %1246 = vmatprep.mubr.f32.mxu1 %v237_v1 }
 0x140   :  { %1247 = vmatmul.mubr.f32.gmra.mrb[6].mxu1 %v238_v23  ;;  %v1032_v23 = vld [vmem:[%s1986_s7] ss:$0 sm:$0xff] }
 0x141   :  { %1309 = vmatprep.mubr.msk.f32.mxu1 %vm101_vm0, %v1836_v8 }
 0x207   :  { %v1239_v7 = vpop.f32.mrb[0].mxu1 }
 0x208   :  { %v334_v25 = vadd.f32 %v1239_v7, %v1029_v6  ;;  %v328_v26 = vpop.f32.mrb[1].mxu1 }
 0x209   :  { %v329_v10 = vadd.f32 %v1029_v6, %v328_v26 }
 0x20a   :  { %v368_v30 = vmax.f32 %v334_v25, 0.0 }
 0x20b   :  { %v367_v29 = vmax.f32 %v329_v10, 0.0  ;;  %v1242_v13 = vpop.f32.mrb[2].mxu1 }
 0x20c   :  { %v344_v31 = vadd.f32 %v1242_v13, %v1029_v6  ;;  %v338_v34 = vpop.f32.mrb[3].mxu1 }
 0x20d   :  { %v339_v35 = vadd.f32 %v1029_v6, %v338_v34  ;;  %1281 = vmatprep.mubr.f32.mxu0 %v367_v29 }
 0x20e   :  { %1282 = vmatmul.mubr.f32.vlgmr.msra.gmra.mrb[8].mxu0 %v368_v30  ;;  %v370_v39 = vmax.f32 %v344_v31, 0.0 }
 0x20f   :  { %v369_v8 = vmax.f32 %v339_v35, 0.0  ;;  %v1245_v36 = vpop.f32.mrb[4].mxu1  ;;  %1508 = vmatpush3.bf16.msra.mxu0 %v1505_v55 }
 0x210   :  { %v354_v41 = vadd.f32 %v1245_v36, %v1029_v6  ;;  %v348_v42 = vpop.f32.mrb[5].mxu1  ;;  %1510 = vmatprep.subr.bf16.mxu0 %v1509_v57 }
 0x211   :  { %v349_v43 = vadd.f32 %v1029_v6, %v348_v42  ;;  %1284 = vmatprep.mubr.f32.mxu0 %v369_v8 }
 0x212   :  { %1285 = vmatmul.mubr.f32.gmra.mrb[10].mxu0 %v370_v39  ;;  %v372_v46 = vmax.f32 %v354_v41, 0.0 }
 0x213   :  { %v371_v44 = vmax.f32 %v349_v43, 0.0  ;;  %v1248_v45 = vpop.f32.mrb[6].mxu1  ;;  %1512 = vmatpush3.bf16.msra.mxu0 %v1509_v57 }
 0x214   :  { %v364_v47 = vadd.f32 %v1248_v45, %v1029_v6  ;;  %v358_v48 = vpop.f32.mrb[7].mxu1  ;;  %1514 = vmatprep.subr.bf16.mxu0 %v1513_v60 }
 0x215   :  { %v359_v49 = vadd.f32 %v1029_v6, %v358_v48  ;;  %1287 = vmatprep.mubr.f32.mxu0 %v371_v44 }
 0x216   :  { %1288 = vmatmul.mubr.f32.gmra.mrb[12].mxu0 %v372_v46  ;;  %v374_v51 = vmax.f32 %v364_v47, 0.0 }
 0x217   :  { %v373_v50 = vmax.f32 %v359_v49, 0.0  ;;  %1516 = vmatpush3.bf16.msra.mxu0 %v1513_v60 }
 0x218   :  { %1518 = vmatprep.subr.bf16.mxu0 %v1517_v63 }
 0x219   :  { %1290 = vmatprep.mubr.f32.mxu0 %v373_v50 }
 0x21a   :  { %1291 = vmatmul.mubr.f32.gmra.mrb[14].mxu0 %v374_v51 }
 0x21b   :  { %1520 = vmatpush3.bf16.msra.mxu0 %v1517_v63 }
 0x21c   :  { %1522 = vmatprep.subr.bf16.mxu0 %v1521_v9 }
 0x21f   :  { %1524 = vmatpush3.bf16.msra.mxu0 %v1521_v9 }
 0x220   :  { %1526 = vmatprep.subr.bf16.mxu0 %v1525_v14 }
 0x223   :  { %1528 = vmatpush3.bf16.msra.mxu0 %v1525_v14 }
 0x224   :  { %1530 = vmatprep.subr.bf16.mxu0 %v1529_v17 }
 0x227   :  { %1532 = vmatpush3.bf16.msra.mxu0 %v1529_v17 }
 0x2e1   :  { %v1283_v19 = vpop.f32.mrb[8].mxu0 }
 0x2e2   :  { %v470_v20 = vadd.f32 %v1283_v19, %v1030_v18  ;;  %v464_v21 = vpop.f32.mrb[9].mxu0 }
 0x2e3   :  { %v465_v0 = vadd.f32 %v1030_v18, %v464_v21  ;;  %v813_v21 = vld [vmem:[#allocation8 + $0xa0] sm:$0xff] }
 0x2e4   :  { %v504_v1 = vmax.f32 %v470_v20, 0.0  ;;  %v812_v20 = vld [vmem:[#allocation8 + $0x98] sm:$0xff] }
 0x2e5   :  { %v503_v2 = vmax.f32 %v465_v0, 0.0  ;;  %v1286_v4 = vpop.f32.mrb[10].mxu0  ;;  %v816_v0 = vld [vmem:[#allocation8 + $0xb8] sm:$0xff] }
 0x2e6   :  { %v519_v24 = vmul.f32 %v1031_v22, %v504_v1  ;;  %v480_v6 = vadd.f32 %v1286_v4, %v1030_v18  ;;  %v474_v7 = vpop.f32.mrb[11].mxu0  ;;  %v817_v1 = vld [vmem:[#allocation8 + $0xc0] sm:$0xff]  ;;  %v819_v4 = vld [vmem:[#allocation8 + $0xd0] sm:$0xff] }
 0x2e7   :  { %v518_v25 = vmul.f32 %v1031_v22, %v503_v2  ;;  %v475_v26 = vadd.f32 %v1030_v18, %v474_v7  ;;  %v821_v7 = vld [vmem:[#allocation8 + $0xe0] sm:$0xff] }
 0x2e8   :  { %v534_v10 = vadd.f32 %v1032_v23, %v519_v24  ;;  %v506_v29 = vmax.f32 %v480_v6, 0.0  ;;  %v820_v24 = vld [vmem:[#allocation8 + $0xd8] sm:$0xff] }
 0x2e9   :  { %v533_v13 = vadd.f32 %v1032_v23, %v518_v25  ;;  %v505_v30 = vmax.f32 %v475_v26, 0.0  ;;  %v1289_v31 = vpop.f32.mrb[12].mxu0  ;;  %v1557_v6 = vpack.c.bf16 %v820_v24, %v819_v4  ;;  %v822_v25 = vld [vmem:[#allocation8 + $0xe8] sm:$0xff]  ;;  %v1048_v24 = vld [vmem:[%s1986_s7 + $0x1] ss:$0 sm:$0xff] }
 0x2ea   :  { %v1898_v34 = vmax.f32 %v534_v10, 0.0  ;;  %v521_v35 = vmul.f32 %v1031_v22, %v506_v29  ;;  %v490_v8 = vadd.f32 %v1289_v31, %v1030_v18  ;;  %v484_v36 = vpop.f32.mrb[13].mxu0  ;;  %v1561_v26 = vpack.c.bf16 %v822_v25, %v821_v7 }
 0x2eb   :  { %v1900_v39 = vmax.f32 %v533_v13, 0.0  ;;  %v520_v41 = vmul.f32 %v1031_v22, %v505_v30  ;;  %v485_v42 = vadd.f32 %v1030_v18, %v484_v36 }
 0x2ec   :  { %v536_v43 = vadd.f32 %v1032_v23, %v521_v35  ;;  %v508_v44 = vmax.f32 %v490_v8, 0.0 }
 0x2ed   :  { %v535_v45 = vadd.f32 %v1032_v23, %v520_v41  ;;  %v507_v46 = vmax.f32 %v485_v42, 0.0  ;;  %v1292_v47 = vpop.f32.mrb[14].mxu0  ;;  %v1489_v48 = vpack.c.bf16 %v1898_v34, %v1900_v39 }
 0x2ee   :  { %v1904_v49 = vmax.f32 %v536_v43, 0.0  ;;  %v523_v50 = vmul.f32 %v1031_v22, %v508_v44  ;;  %v500_v51 = vadd.f32 %v1292_v47, %v1030_v18  ;;  %v494_v52 = vpop.f32.mrb[15].mxu0 }
 0x2ef   :  { %v1906_v53 = vmax.f32 %v535_v45, 0.0  ;;  %v522_v54 = vmul.f32 %v1031_v22, %v507_v46  ;;  %v495_v55 = vadd.f32 %v1030_v18, %v494_v52  ;;  %1490 = vmatprep.subr.bf16.mxu1 %v1489_v48  ;;  %v810_v18 = vld [vmem:[#allocation8 + $0x88] sm:$0xff] }
 0x2f0   :  { %v538_v56 = vadd.f32 %v1032_v23, %v523_v50  ;;  %v510_v57 = vmax.f32 %v500_v51, 0.0  ;;  %1492 = vmatpush3.bf16.msra.mxu1 %v1489_v48  ;;  %v823_v50 = vld [vmem:[#allocation8 + $0xf0] sm:$0xff]  ;;  %v824_v51 = vld [vmem:[#allocation8 + $0xf8] sm:$0xff] }
 0x2f1   :  { %v537_v58 = vadd.f32 %v1032_v23, %v522_v54  ;;  %v509_v59 = vmax.f32 %v495_v55, 0.0  ;;  %v1493_v60 = vpack.c.bf16 %v1904_v49, %v1906_v53  ;;  %v1565_v52 = vpack.c.bf16 %v824_v51, %v823_v50  ;;  %v1042_v54 = vld [vmem:[%s1982_s3 + $0x1] ss:$0 sm:$0xff] }
 0x2f2   :  { %v1910_v61 = vmax.f32 %v538_v56, 0.0  ;;  %v525_v62 = vmul.f32 %v1031_v22, %v510_v57 }
 0x2f3   :  { %v1912_v63 = vmax.f32 %v537_v58, 0.0  ;;  %v524_v3 = vmul.f32 %v1031_v22, %v509_v59  ;;  %1494 = vmatprep.subr.bf16.mxu1 %v1493_v60  ;;  %v814_v22 = vld [vmem:[#allocation8 + $0xa8] sm:$0xff] }
 0x2f4   :  { %v540_v5 = vadd.f32 %v1032_v23, %v525_v62  ;;  %1496 = vmatpush3.bf16.msra.mxu1 %v1493_v60 }
 0x2f5   :  { %v539_v9 = vadd.f32 %v1032_v23, %v524_v3  ;;  %v1497_v11 = vpack.c.bf16 %v1910_v61, %v1912_v63  ;;  %v818_v23 = vld [vmem:[#allocation8 + $0xc8] sm:$0xff] }
 0x2f6   :  { %v1916_v12 = vmax.f32 %v540_v5, 0.0  ;;  %v1553_v2 = vpack.c.bf16 %v818_v23, %v817_v1  ;;  %v1046_v23 = vld [vmem:[%s1985_s6 + $0x1] ss:$0 sm:$0xff] }
 0x2f7   :  { %v1918_v14 = vmax.f32 %v539_v9, 0.0  ;;  %1498 = vmatprep.subr.bf16.mxu1 %v1497_v11 }
 0x2f8   :  { %1500 = vmatpush3.bf16.msra.mxu1 %v1497_v11 }
 0x2f9   :  { %v1501_v15 = vpack.c.bf16 %v1916_v12, %v1918_v14 }
 0x2fb   :  { %1502 = vmatprep.subr.bf16.mxu1 %v1501_v15 }
 0x2fc   :  { %1504 = vmatpush3.bf16.msra.mxu1 %v1501_v15 }
 0x2ff   :  { %1310 = vmatmul.mubr.msk.f32.vlgmr.msra.gmra.mrb[8].mxu1 %vm101_vm0, %v1848_v27  ;;  %v686_v27 = vld [vmem:[#allocation7 + $0xf8] sm:$0xff] }
 0x300   :  { %1312 = vmatprep.mubr.msk.f32.mxu1 %vm101_vm0, %v1850_v28  ;;  %v1533_v17 = vpack.c.bf16 %v686_v27, %v685_v16  ;;  %v809_v28 = vld [vmem:[#allocation8 + $0x80] sm:$0xff] }
 0x301   :  { %v1537_v19 = vpack.c.bf16 %v810_v18, %v809_v28 }
 0x302   :  { %1534 = vmatprep.subr.bf16.mxu0 %v1533_v17 }
 0x303   :  { %1313 = vmatmul.mubr.msk.f32.gmra.mrb[10].mxu1 %vm101_vm0, %v1856_v32  ;;  %1536 = vmatpush3.bf16.msra.mxu0 %v1533_v17  ;;  %v811_v32 = vld [vmem:[#allocation8 + $0x90] sm:$0xff] }
 0x304   :  { %1315 = vmatprep.mubr.msk.f32.mxu1 %vm101_vm0, %v1858_v33  ;;  %v1541_v33 = vpack.c.bf16 %v812_v20, %v811_v32  ;;  %1538 = vmatprep.subr.bf16.mxu1 %v1537_v19 }
 0x305   :  { %1540 = vmatpush3.bf16.msra.mxu1 %v1537_v19 }
 0x306   :  { %1542 = vmatprep.subr.bf16.mxu1 %v1541_v33 }
 0x307   :  { %1316 = vmatmul.mubr.msk.f32.gmra.mrb[12].mxu1 %vm101_vm0, %v1864_v37  ;;  %v1545_v37 = vpack.c.bf16 %v814_v22, %v813_v21 }
 0x308   :  { %1318 = vmatprep.mubr.msk.f32.mxu1 %vm101_vm0, %v1866_v38  ;;  %v815_v38 = vld [vmem:[#allocation8 + $0xb0] sm:$0xff] }
 0x309   :  { %1544 = vmatpush3.bf16.msra.mxu1 %v1541_v33 }
 0x30a   :  { %1546 = vmatprep.subr.bf16.mxu1 %v1545_v37 }
 0x30b   :  { %1319 = vmatmul.mubr.msk.f32.gmra.mrb[14].mxu1 %vm101_vm0, %v1872_v40  ;;  %v1549_v40 = vpack.c.bf16 %v816_v0, %v815_v38  ;;  %v1044_v38 = vld [vmem:[%s1984_s5 + $0x1] ss:$0 sm:$0xff]  ;;  %s1700_s5 = smov [#allocation10]  }
 0x30c   :  { %s1007_s6 = sshll.u32 %s1700_s5, 4  ;;  %s1008_s6 = int_to_ptr.vmem [resolvable:$true] %s1007_s6 }
 0x30d   :  { %1548 = vmatpush3.bf16.msra.mxu1 %v1545_v37  ;;  %s1664_s7 = scalar_lea.vmem %s1008_s6, 1024  ;;  %p1669_p5 = scmp.lt.s32.totalorder %s1008_s6, %s1008_s6 }
 0x30e   :  { %1550 = vmatprep.subr.bf16.mxu1 %v1549_v40  ;;  %p1665_p4 = scmp.ne.s32.totalorder %s1008_s6, %s1664_s7  ;;  %p1670_p6 = scmp.lt.s32.totalorder %s1664_s7, %s1664_s7 }
 0x310   :  { %p1671_p7 = por %p1670_p6, %p1669_p5 }
 0x311   :  { %1552 = vmatpush3.bf16.msra.mxu1 %v1549_v40 }
 0x312   :  { %1554 = vmatprep.subr.bf16.mxu1 %v1553_v2  ;;  %p1672_p8 = pnand %p1671_p7, %p1665_p4 }
 0x315   :  { %1556 = vmatpush3.bf16.msra.mxu1 %v1553_v2 }
 0x316   :  { %1558 = vmatprep.subr.bf16.mxu1 %v1557_v6 }
 0x319   :  { %1560 = vmatpush3.bf16.msra.mxu1 %v1557_v6 }
 0x31a   :  { %1562 = vmatprep.subr.bf16.mxu1 %v1561_v26 }
 0x31d   :  { %1564 = vmatpush3.bf16.msra.mxu1 %v1561_v26 }
 0x31e   :  { %1566 = vmatprep.subr.bf16.mxu1 %v1565_v52 }
 0x321   :  { %1568 = vmatpush3.bf16.msra.mxu1 %v1565_v52 }
 0x3d2   :  { %v1311_v10 = vpop.f32.mrb[8].mxu1 }
 0x3d3   :  { %v623_v29 = vpop.f32.mrb[9].mxu1  ;;  %v663_v30 = vadd.f32 %v1311_v10, %v1898_v34 }
 0x3d4   :  { %v662_v13 = vadd.f32 %v623_v29, %v1900_v39 }
 0x3d6   :  { %v1314_v31 = vpop.f32.mrb[10].mxu1  ;;  %1353 = vmatprep.mubr.f32.mxu0 %v662_v13 }
 0x3d7   :  { %v633_v35 = vpop.f32.mrb[11].mxu1  ;;  %1354 = vmatmul.mubr.f32.vlgmr.msra.gmra.mrb[16].mxu0 %v663_v30  ;;  %v665_v36 = vadd.f32 %v1314_v31, %v1904_v49 }
 0x3d8   :  { %v664_v8 = vadd.f32 %v633_v35, %v1906_v53 }
 0x3da   :  { %v1317_v41 = vpop.f32.mrb[12].mxu1  ;;  %1356 = vmatprep.mubr.f32.mxu0 %v664_v8 }
 0x3db   :  { %v643_v42 = vpop.f32.mrb[13].mxu1  ;;  %1357 = vmatmul.mubr.f32.gmra.mrb[18].mxu0 %v665_v36  ;;  %v667_v44 = vadd.f32 %v1317_v41, %v1910_v61 }
 0x3dc   :  { %v666_v43 = vadd.f32 %v643_v42, %v1912_v63 }
 0x3de   :  { %v1320_v45 = vpop.f32.mrb[14].mxu1  ;;  %1359 = vmatprep.mubr.f32.mxu0 %v666_v43 }
 0x3df   :  { %v653_v46 = vpop.f32.mrb[15].mxu1  ;;  %1360 = vmatmul.mubr.f32.gmra.mrb[20].mxu0 %v667_v44  ;;  %v669_v48 = vadd.f32 %v1320_v45, %v1916_v12 }
 0x3e0   :  { %v668_v47 = vadd.f32 %v653_v46, %v1918_v14 }
 0x3e2   :  { %1362 = vmatprep.mubr.f32.mxu0 %v668_v47 }
 0x3e3   :  { %1363 = vmatmul.mubr.f32.gmra.mrb[22].mxu0 %v669_v48 }
 0x4aa   :  { %v1355_v55 = vpop.f32.mrb[16].mxu0 }
 0x4ab   :  { %v767_v56 = vadd.f32 %v1355_v55, %v1042_v54  ;;  %v761_v57 = vpop.f32.mrb[17].mxu0 }
 0x4ac   :  { %v762_v58 = vadd.f32 %v1042_v54, %v761_v57 }
 0x4ad   :  { %v801_v62 = vmax.f32 %v767_v56, 0.0 }
 0x4ae   :  { %v800_v59 = vmax.f32 %v762_v58, 0.0  ;;  %v1358_v60 = vpop.f32.mrb[18].mxu0 }
 0x4af   :  { %v777_v3 = vadd.f32 %v1358_v60, %v1042_v54  ;;  %v771_v5 = vpop.f32.mrb[19].mxu0 }
 0x4b0   :  { %v772_v9 = vadd.f32 %v1042_v54, %v771_v5  ;;  %1397 = vmatprep.mubr.f32.mxu1 %v800_v59 }
 0x4b1   :  { %1398 = vmatmul.mubr.f32.vlgmr.msra.gmra.mrb[16].mxu1 %v801_v62  ;;  %v803_v16 = vmax.f32 %v777_v3, 0.0 }
 0x4b2   :  { %v802_v11 = vmax.f32 %v772_v9, 0.0  ;;  %v1361_v15 = vpop.f32.mrb[20].mxu0 }
 0x4b3   :  { %v787_v27 = vadd.f32 %v1361_v15, %v1042_v54  ;;  %v781_v17 = vpop.f32.mrb[21].mxu0 }
 0x4b4   :  { %v782_v28 = vadd.f32 %v1042_v54, %v781_v17  ;;  %1400 = vmatprep.mubr.f32.mxu1 %v802_v11 }
 0x4b5   :  { %1401 = vmatmul.mubr.f32.gmra.mrb[18].mxu1 %v803_v16  ;;  %v805_v19 = vmax.f32 %v787_v27, 0.0 }
 0x4b6   :  { %v804_v18 = vmax.f32 %v782_v28, 0.0  ;;  %v1364_v32 = vpop.f32.mrb[22].mxu0 }
 0x4b7   :  { %v797_v20 = vadd.f32 %v1364_v32, %v1042_v54  ;;  %v791_v33 = vpop.f32.mrb[23].mxu0 }
 0x4b8   :  { %v792_v21 = vadd.f32 %v1042_v54, %v791_v33  ;;  %1403 = vmatprep.mubr.f32.mxu1 %v804_v18 }
 0x4b9   :  { %1404 = vmatmul.mubr.f32.gmra.mrb[20].mxu1 %v805_v19  ;;  %v807_v37 = vmax.f32 %v797_v20, 0.0 }
 0x4ba   :  { %v806_v22 = vmax.f32 %v792_v21, 0.0 }
 0x4bc   :  { %1406 = vmatprep.mubr.f32.mxu1 %v806_v22 }
 0x4bd   :  { %1407 = vmatmul.mubr.f32.gmra.mrb[22].mxu1 %v807_v37 }
 0x584   :  { %v1399_v0 = vpop.f32.mrb[16].mxu1 }
 0x585   :  { %v905_v40 = vadd.f32 %v1399_v0, %v1044_v38  ;;  %v899_v1 = vpop.f32.mrb[17].mxu1 }
 0x586   :  { %v900_v2 = vadd.f32 %v1044_v38, %v899_v1 }
 0x587   :  { %v939_v4 = vmax.f32 %v905_v40, 0.0 }
 0x588   :  { %v938_v6 = vmax.f32 %v900_v2, 0.0  ;;  %v1402_v7 = vpop.f32.mrb[18].mxu1 }
 0x589   :  { %v955_v25 = vmul.f32 %v1046_v23, %v939_v4  ;;  %v915_v26 = vadd.f32 %v1402_v7, %v1044_v38  ;;  %v909_v10 = vpop.f32.mrb[19].mxu1 }
 0x58a   :  { %v954_v29 = vmul.f32 %v1046_v23, %v938_v6  ;;  %v910_v13 = vadd.f32 %v1044_v38, %v909_v10 }
 0x58b   :  { %v971_v30 = vadd.f32 %v1048_v24, %v955_v25  ;;  %v941_v31 = vmax.f32 %v915_v26, 0.0 }
 0x58c   :  { %v970_v35 = vadd.f32 %v1048_v24, %v954_v29  ;;  %v940_v8 = vmax.f32 %v910_v13, 0.0  ;;  %v1405_v36 = vpop.f32.mrb[20].mxu1 }
 0x58d   :  { %v979_v41 = vmax.f32 %v971_v30, 0.0  ;;  %v957_v42 = vmul.f32 %v1046_v23, %v941_v31  ;;  %v925_v43 = vadd.f32 %v1405_v36, %v1044_v38  ;;  %v919_v44 = vpop.f32.mrb[21].mxu1 }
 0x58e   :  { %v978_v45 = vmax.f32 %v970_v35, 0.0  ;;  %v956_v46 = vmul.f32 %v1046_v23, %v940_v8  ;;  %v920_v47 = vadd.f32 %v1044_v38, %v919_v44 }
 0x58f   :  { %v987_v48 = vadd.f32 %v979_v41, %v1898_v34  ;;  %v973_v50 = vadd.f32 %v1048_v24, %v957_v42  ;;  %v943_v51 = vmax.f32 %v925_v43, 0.0 }
 0x590   :  { %v986_v52 = vadd.f32 %v978_v45, %v1900_v39  ;;  %v972_v54 = vadd.f32 %v1048_v24, %v956_v46  ;;  %v942_v55 = vmax.f32 %v920_v47, 0.0  ;;  %v1408_v56 = vpop.f32.mrb[22].mxu1 }
 0x591   :  { %995 = vst [vmem:[#allocation10 + $0x8] sm:$0xff] %v987_v48  ;;  %v981_v57 = vmax.f32 %v973_v50, 0.0  ;;  %v959_v58 = vmul.f32 %v1046_v23, %v943_v51  ;;  %v935_v59 = vadd.f32 %v1408_v56, %v1044_v38  ;;  %v929_v60 = vpop.f32.mrb[23].mxu1 }
 0x592   :  { %994 = vst [vmem:[#allocation10] sm:$0xff] %v986_v52  ;;  %v980_v62 = vmax.f32 %v972_v54, 0.0  ;;  %v958_v3 = vmul.f32 %v1046_v23, %v942_v55  ;;  %v930_v5 = vadd.f32 %v1044_v38, %v929_v60 }
 0x593   :  { %v989_v9 = vadd.f32 %v981_v57, %v1904_v49  ;;  %v975_v11 = vadd.f32 %v1048_v24, %v959_v58  ;;  %v945_v34 = vmax.f32 %v935_v59, 0.0 }
 0x594   :  { %v988_v15 = vadd.f32 %v980_v62, %v1906_v53  ;;  %v974_v16 = vadd.f32 %v1048_v24, %v958_v3  ;;  %v944_v39 = vmax.f32 %v930_v5, 0.0 }
 0x595   :  { %997 = vst [vmem:[#allocation10 + $0x18] sm:$0xff] %v989_v9  ;;  %v983_v27 = vmax.f32 %v975_v11, 0.0  ;;  %v961_v17 = vmul.f32 %v1046_v23, %v945_v34 }
 0x596   :  { %996 = vst [vmem:[#allocation10 + $0x10] sm:$0xff] %v988_v15  ;;  %v982_v28 = vmax.f32 %v974_v16, 0.0  ;;  %v960_v18 = vmul.f32 %v1046_v23, %v944_v39 }
 0x597   :  { %v991_v32 = vadd.f32 %v983_v27, %v1910_v61  ;;  %v977_v19 = vadd.f32 %v1048_v24, %v961_v17 }
 0x598   :  { %v990_v20 = vadd.f32 %v982_v28, %v1912_v63  ;;  %v976_v33 = vadd.f32 %v1048_v24, %v960_v18 }
 0x599   :  { %999 = vst [vmem:[#allocation10 + $0x28] sm:$0xff] %v991_v32  ;;  %v985_v49 = vmax.f32 %v977_v19, 0.0 }
 0x59a   :  { %998 = vst [vmem:[#allocation10 + $0x20] sm:$0xff] %v990_v20  ;;  %v984_v53 = vmax.f32 %v976_v33, 0.0 }
 0x59b   :  { %v993_v21 = vadd.f32 %v985_v49, %v1916_v12 }
 0x59c   :  { %v992_v22 = vadd.f32 %v984_v53, %v1918_v14 }
 0x59d   :  { %1001 = vst [vmem:[#allocation10 + $0x38] sm:$0xff] %v993_v21 }
 0x59e   :  { %1000 = vst [vmem:[#allocation10 + $0x30] sm:$0xff] %v992_v22 }
 0x59f   :  { %1675 = shalt.err (!%p1672_p8)
}
 0x5a0   :  { %s1676_s26 = scalar_lea.hbm %s1987_s8, 1024 }
 0x5a1   :  { %p1677_p9 = scmp.ne.s32.totalorder %s1987_s8, %s1676_s26  ;;  %p1680_p10 = scmp.lt.u32.totalorder %s1676_s26, %s1987_s8 }
 0x5a3   :  { %p1682_p11 = pnand %p1680_p10, %p1677_p9 }
 0x5a5   :  { %1685 = shalt.err (!%p1682_p11)
}
 0x5a6   :  { %1013 = dma.vmem_to_hbm [thread:$0]  %s1008_s6, 1024, %s1987_s8, [#allocation4], %s1696_s17, %s1696_s17, %s1697_s18  }
 0x5a7   :  { %1692 = dma.done.wait [#allocation4], 1024  }
 0x5a8   :  { %1693 = vsyncadd [#allocation4], 4294966272 }
 0x5a9   :  { %1017 = vsyncpa [#allocation3], 1 }
 0x5aa   :  { %1018 = vsyncpa [#allocation6], 1 }
 0x5ab   :  { %1019 = vsyncpa [#allocation9], 1 }
 0x5ac   :  { %1020 = vsyncpa [#allocation4], 1 }

</bundles_post_ra>
